<compile_context>
chip_gen: v7x
topology: tpu7x:2x2x1
jax: 0.10.0
libtpu: 0.0.40
codegen_flags: <defaults>
</compile_context>

<pallas_src>
import functools

import jax
import jax.numpy as jnp
from jax import lax
from jax.experimental import pallas as pl
from jax.experimental.pallas import tpu as pltpu

INPUT_DIM = 512
HIDDEN_DIM = 256
OUTPUT_DIM = 512
EPS = 1e-12  # torch F.normalize default eps


def _l2_normalize(x):
    # x / max(||x||, eps) == x * rsqrt(max(sum(x^2), eps^2))  (sqrt monotone).
    # rsqrt runs on the EUP slot; the divide is replaced by a multiply.
    sumsq = jnp.sum(x * x, axis=1, keepdims=True)
    return x * lax.rsqrt(jnp.maximum(sumsq, EPS * EPS))


def clip_to_clap_kernel(x_ref, w1_ref, b1_ref, w2_ref, b2_ref, w3_ref, b3_ref,
                        o_ref):
    # Elementwise math (normalize, bias, ReLU) in f32; MXU operands in bf16
    # with f32 accumulation.
    x = _l2_normalize(x_ref[...].astype(jnp.float32))

    h1 = jnp.dot(x.astype(jnp.bfloat16), w1_ref[...],
                 preferred_element_type=jnp.float32)
    h1 = jnp.maximum(h1 + b1_ref[...], 0.0)

    h2 = jnp.dot(h1.astype(jnp.bfloat16), w2_ref[...],
                 preferred_element_type=jnp.float32)
    h2 = jnp.maximum(h2 + b2_ref[...], 0.0)

    y = jnp.dot(h2.astype(jnp.bfloat16), w3_ref[...],
                preferred_element_type=jnp.float32)
    y = y + b3_ref[...]

    o_ref[...] = _l2_normalize(y).astype(o_ref.dtype)


def _round_up(n, m):
    return (n + m - 1) // m * m


def prepare_params(w1, b1, w2, b2, w3, b3):
    """Cast weights to bf16 / biases to f32 row-vectors once (model init)."""
    return (w1.astype(jnp.bfloat16), b1.reshape(1, -1).astype(jnp.float32),
            w2.astype(jnp.bfloat16), b2.reshape(1, -1).astype(jnp.float32),
            w3.astype(jnp.bfloat16), b3.reshape(1, -1).astype(jnp.float32))


@functools.partial(jax.jit, static_argnames=("block_m",))
def clip_to_clap(x, w1, b1, w2, b2, w3, b3, *, block_m=512):
    B, D_in = x.shape
    D_h = w1.shape[1]
    D_out = w3.shape[1]
    assert w1.shape == (D_in, D_h) and w2.shape == (D_h, D_h)
    assert w3.shape == (D_h, D_out)

    # bf16 activations on the HBM side (halves x/y DMA traffic); normalize
    # still happens in f32 inside the kernel.  Weight casts / bias reshapes
    # are no-ops if prepare_params() was used.
    x = x.astype(jnp.bfloat16)
    w1 = w1.astype(jnp.bfloat16)
    w2 = w2.astype(jnp.bfloat16)
    w3 = w3.astype(jnp.bfloat16)
    b1 = b1.reshape(1, D_h).astype(jnp.float32)
    b2 = b2.reshape(1, D_h).astype(jnp.float32)
    b3 = b3.reshape(1, D_out).astype(jnp.float32)

    # Balanced batch tiles:
    #   * at least 2 tiles when B >= 16 so both v7x TensorCores get work,
    #   * no tile larger than block_m,
    #   * tm rounded up to 8 (sublane alignment) -> <= 8 padded rows per tile.
    # Padded zero rows are harmless (eps clamp avoids 0/0) and sliced off.
    num_tiles = max(-(-B // block_m), 2 if B >= 16 else 1)
    tm = _round_up(-(-B // num_tiles), 8)
    b_pad = tm * num_tiles
    if b_pad != B:
        x = jnp.pad(x, ((0, b_pad - B), (0, 0)))

    # Weights/biases resident in VMEM across the whole grid (constant index_map).
    resident = lambda shape: pl.BlockSpec(shape, lambda i: (0, 0))

    out = pl.pallas_call(
        clip_to_clap_kernel,
        out_shape=jax.ShapeDtypeStruct((b_pad, D_out), jnp.bfloat16),
        grid=(num_tiles,),
        in_specs=[
            pl.BlockSpec((tm, D_in), lambda i: (i, 0)),   # x: tiled over batch
            resident((D_in, D_h)), resident((1, D_h)),    # fc1 (resident)
            resident((D_h, D_h)), resident((1, D_h)),     # fc2 (resident)
            resident((D_h, D_out)), resident((1, D_out)), # fc3 (resident)
        ],
        out_specs=pl.BlockSpec((tm, D_out), lambda i: (i, 0)),
        compiler_params=pltpu.CompilerParams(
            dimension_semantics=("parallel",),
            vmem_limit_bytes=32 << 20,
        ),
    )(x, w1, b1, w2, b2, w3, b3)

    return out[:B] if b_pad != B else out


def reference(x, w1, b1, w2, b2, w3, b3):
    x = x / jnp.maximum(jnp.linalg.norm(x, axis=1, keepdims=True), EPS)
    h = jnp.maximum(x @ w1 + b1, 0.0)
    h = jnp.maximum(h @ w2 + b2, 0.0)
    y = h @ w3 + b3
    return y / jnp.maximum(jnp.linalg.norm(y, axis=1, keepdims=True), EPS)


if __name__ == "__main__":
    key = jax.random.PRNGKey(0)
    kx, k1, k2, k3, kb1, kb2, kb3, kx2 = jax.random.split(key, 8)

    # Deterministic synthetic parameters (shapes from nn.Linear in __init__),
    # stored as (in, out) = transpose of PyTorch's (out, in) layout.
    w1 = jax.random.normal(k1, (INPUT_DIM, HIDDEN_DIM), jnp.float32) * 0.05
    b1 = jax.random.normal(kb1, (1, HIDDEN_DIM), jnp.float32) * 0.05
    w2 = jax.random.normal(k2, (HIDDEN_DIM, HIDDEN_DIM), jnp.float32) * 0.05
    b2 = jax.random.normal(kb2, (1, HIDDEN_DIM), jnp.float32) * 0.05
    w3 = jax.random.normal(k3, (HIDDEN_DIM, OUTPUT_DIM), jnp.float32) * 0.05
    b3 = jax.random.normal(kb3, (1, OUTPUT_DIM), jnp.float32) * 0.05

    # One-time param preparation (bf16 weights, f32 row-vector biases).
    params = prepare_params(w1, b1, w2, b2, w3, b3)

    # Small-batch case (single tile).
    B = 8
    x = jax.random.normal(kx, (B, INPUT_DIM), dtype=jnp.float32)
    out = jax.block_until_ready(clip_to_clap(x, *params))
    ref = reference(x, w1, b1, w2, b2, w3, b3)
    assert out.shape == (B, OUTPUT_DIM)
    # bf16 I/O + bf16 matmul operands (f32 accumulation) -> loosened tolerance.
    assert jnp.allclose(out.astype(jnp.float32), ref, atol=2e-2, rtol=2e-2), \
        "mismatch vs reference (B=8)"

    # Multi-tile + padding case (exercises the parallel batch grid: 2 balanced
    # tiles of 152 rows for B=300).
    B2 = 300
    x2 = jax.random.normal(kx2, (B2, INPUT_DIM), dtype=jnp.float32)
    out2 = jax.block_until_ready(clip_to_clap(x2, *params))
    ref2 = reference(x2, w1, b1, w2, b2, w3, b3)
    assert out2.shape == (B2, OUTPUT_DIM)
    assert jnp.allclose(out2.astype(jnp.float32), ref2, atol=2e-2, rtol=2e-2), \
        "mismatch vs reference (B=300)"

    print("KERNEL_OK")
</pallas_src>

<mosaic_0001>
module attributes {stable_mosaic.version = 11 : i64} {
  func.func @clip_to_clap_kernel(%arg0: i32, %arg1: memref<8x512xbf16, #tpu.memory_space<vmem>>, %arg2: memref<512x256xbf16, #tpu.memory_space<vmem>>, %arg3: memref<1x256xf32, #tpu.memory_space<vmem>>, %arg4: memref<256x256xbf16, #tpu.memory_space<vmem>>, %arg5: memref<1x256xf32, #tpu.memory_space<vmem>>, %arg6: memref<256x512xbf16, #tpu.memory_space<vmem>>, %arg7: memref<1x512xf32, #tpu.memory_space<vmem>>, %arg8: memref<8x512xbf16, #tpu.memory_space<vmem>>) attributes {dimension_semantics = [#tpu.dimension_semantics<parallel>], iteration_bounds = array<i64: 1>, scalar_prefetch = 0 : i64, scratch_operands = 0 : i64, tpu.core_type = #tpu.core_type<tc>, window_params = [{transform_indices = @transform_0, window_bounds = array<i64: 8, 512>}, {pipeline_mode = #tpu.pipeline_mode<synchronous>, transform_indices = @transform_1, window_bounds = array<i64: 512, 256>}, {pipeline_mode = #tpu.pipeline_mode<synchronous>, transform_indices = @transform_2, window_bounds = array<i64: 1, 256>}, {pipeline_mode = #tpu.pipeline_mode<synchronous>, transform_indices = @transform_3, window_bounds = array<i64: 256, 256>}, {pipeline_mode = #tpu.pipeline_mode<synchronous>, transform_indices = @transform_4, window_bounds = array<i64: 1, 256>}, {pipeline_mode = #tpu.pipeline_mode<synchronous>, transform_indices = @transform_5, window_bounds = array<i64: 256, 512>}, {pipeline_mode = #tpu.pipeline_mode<synchronous>, transform_indices = @transform_6, window_bounds = array<i64: 1, 512>}, {transform_indices = @transform_7, window_bounds = array<i64: 8, 512>}]} {
    %c0 = arith.constant 0 : index
    %c0_0 = arith.constant 0 : index
    %0 = vector.load %arg1[%c0, %c0_0] : memref<8x512xbf16, #tpu.memory_space<vmem>>, vector<8x512xbf16>
    %1 = arith.extf %0 : vector<8x512xbf16> to vector<8x512xf32>
    %2 = arith.mulf %1, %1 : vector<8x512xf32>
    %cst = arith.constant dense<0.000000e+00> : vector<8xf32>
    %3 = vector.multi_reduction <add>, %2, %cst [1] : vector<8x512xf32> to vector<8xf32>
    %4 = vector.shape_cast %3 : vector<8xf32> to vector<8x1xf32>
    %cst_1 = arith.constant 1.000000e-24 : f32
    %5 = vector.broadcast %cst_1 : f32 to vector<8x1xf32>
    %6 = arith.maximumf %4, %5 : vector<8x1xf32>
    %7 = math.rsqrt %6 : vector<8x1xf32>
    %8 = vector.broadcast %7 : vector<8x1xf32> to vector<8x512xf32>
    %9 = arith.mulf %1, %8 : vector<8x512xf32>
    %10 = arith.truncf %9 : vector<8x512xf32> to vector<8x512xbf16>
    %c0_2 = arith.constant 0 : index
    %c0_3 = arith.constant 0 : index
    %11 = vector.load %arg2[%c0_2, %c0_3] : memref<512x256xbf16, #tpu.memory_space<vmem>>, vector<512x256xbf16>
    %cst_4 = arith.constant dense<0.000000e+00> : vector<8x256xf32>
    %12 = tpu.matmul %10, %11, %cst_4 {dimension_numbers = #tpu.dot_dimension_numbers<[1], [0], [0], [1], [0, 0, 1, 1], [], []>} : vector<8x512xbf16>, vector<512x256xbf16>, vector<8x256xf32> -> vector<8x256xf32>
    %c0_5 = arith.constant 0 : index
    %c0_6 = arith.constant 0 : index
    %13 = vector.load %arg3[%c0_5, %c0_6] : memref<1x256xf32, #tpu.memory_space<vmem>>, vector<1x256xf32>
    %14 = vector.broadcast %13 : vector<1x256xf32> to vector<8x256xf32>
    %15 = arith.addf %12, %14 : vector<8x256xf32>
    %cst_7 = arith.constant 0.000000e+00 : f32
    %16 = vector.broadcast %cst_7 : f32 to vector<8x256xf32>
    %17 = arith.maximumf %15, %16 : vector<8x256xf32>
    %18 = arith.truncf %17 : vector<8x256xf32> to vector<8x256xbf16>
    %c0_8 = arith.constant 0 : index
    %c0_9 = arith.constant 0 : index
    %19 = vector.load %arg4[%c0_8, %c0_9] : memref<256x256xbf16, #tpu.memory_space<vmem>>, vector<256x256xbf16>
    %cst_10 = arith.constant dense<0.000000e+00> : vector<8x256xf32>
    %20 = tpu.matmul %18, %19, %cst_10 {dimension_numbers = #tpu.dot_dimension_numbers<[1], [0], [0], [1], [0, 0, 1, 1], [], []>} : vector<8x256xbf16>, vector<256x256xbf16>, vector<8x256xf32> -> vector<8x256xf32>
    %c0_11 = arith.constant 0 : index
    %c0_12 = arith.constant 0 : index
    %21 = vector.load %arg5[%c0_11, %c0_12] : memref<1x256xf32, #tpu.memory_space<vmem>>, vector<1x256xf32>
    %22 = vector.broadcast %21 : vector<1x256xf32> to vector<8x256xf32>
    %23 = arith.addf %20, %22 : vector<8x256xf32>
    %cst_13 = arith.constant 0.000000e+00 : f32
    %24 = vector.broadcast %cst_13 : f32 to vector<8x256xf32>
    %25 = arith.maximumf %23, %24 : vector<8x256xf32>
    %26 = arith.truncf %25 : vector<8x256xf32> to vector<8x256xbf16>
    %c0_14 = arith.constant 0 : index
    %c0_15 = arith.constant 0 : index
    %27 = vector.load %arg6[%c0_14, %c0_15] : memref<256x512xbf16, #tpu.memory_space<vmem>>, vector<256x512xbf16>
    %cst_16 = arith.constant dense<0.000000e+00> : vector<8x512xf32>
    %28 = tpu.matmul %26, %27, %cst_16 {dimension_numbers = #tpu.dot_dimension_numbers<[1], [0], [0], [1], [0, 0, 1, 1], [], []>} : vector<8x256xbf16>, vector<256x512xbf16>, vector<8x512xf32> -> vector<8x512xf32>
    %c0_17 = arith.constant 0 : index
    %c0_18 = arith.constant 0 : index
    %29 = vector.load %arg7[%c0_17, %c0_18] : memref<1x512xf32, #tpu.memory_space<vmem>>, vector<1x512xf32>
    %30 = vector.broadcast %29 : vector<1x512xf32> to vector<8x512xf32>
    %31 = arith.addf %28, %30 : vector<8x512xf32>
    %32 = arith.mulf %31, %31 : vector<8x512xf32>
    %cst_19 = arith.constant dense<0.000000e+00> : vector<8xf32>
    %33 = vector.multi_reduction <add>, %32, %cst_19 [1] : vector<8x512xf32> to vector<8xf32>
    %34 = vector.shape_cast %33 : vector<8xf32> to vector<8x1xf32>
    %cst_20 = arith.constant 1.000000e-24 : f32
    %35 = vector.broadcast %cst_20 : f32 to vector<8x1xf32>
    %36 = arith.maximumf %34, %35 : vector<8x1xf32>
    %37 = math.rsqrt %36 : vector<8x1xf32>
    %38 = vector.broadcast %37 : vector<8x1xf32> to vector<8x512xf32>
    %39 = arith.mulf %31, %38 : vector<8x512xf32>
    %40 = arith.truncf %39 : vector<8x512xf32> to vector<8x512xbf16>
    %c0_21 = arith.constant 0 : index
    %c0_22 = arith.constant 0 : index
    %41 = vector.load %arg8[%c0_21, %c0_22] : memref<8x512xbf16, #tpu.memory_space<vmem>>, vector<8x512xbf16>
    tpu.vector_store %arg8[%c0_21, %c0_22], %40 {strides = array<i32>} : memref<8x512xbf16, #tpu.memory_space<vmem>>, vector<8x512xbf16>,
    return
  }
  func.func @transform_0(%arg0: i32) -> (i32, i32) {
    %c0_i32 = arith.constant 0 : i32
    %c0_i32_0 = arith.constant 0 : i32
    return %arg0, %c0_i32 : i32, i32
  }
  func.func @transform_1(%arg0: i32) -> (i32, i32) {
    %c0_i32 = arith.constant 0 : i32
    %c0_i32_0 = arith.constant 0 : i32
    %c0_i32_1 = arith.constant 0 : i32
    return %c0_i32, %c0_i32_0 : i32, i32
  }
  func.func @transform_2(%arg0: i32) -> (i32, i32) {
    %c0_i32 = arith.constant 0 : i32
    %c0_i32_0 = arith.constant 0 : i32
    %c0_i32_1 = arith.constant 0 : i32
    return %c0_i32, %c0_i32_0 : i32, i32
  }
  func.func @transform_3(%arg0: i32) -> (i32, i32) {
    %c0_i32 = arith.constant 0 : i32
    %c0_i32_0 = arith.constant 0 : i32
    %c0_i32_1 = arith.constant 0 : i32
    return %c0_i32, %c0_i32_0 : i32, i32
  }
  func.func @transform_4(%arg0: i32) -> (i32, i32) {
    %c0_i32 = arith.constant 0 : i32
    %c0_i32_0 = arith.constant 0 : i32
    %c0_i32_1 = arith.constant 0 : i32
    return %c0_i32, %c0_i32_0 : i32, i32
  }
  func.func @transform_5(%arg0: i32) -> (i32, i32) {
    %c0_i32 = arith.constant 0 : i32
    %c0_i32_0 = arith.constant 0 : i32
    %c0_i32_1 = arith.constant 0 : i32
    return %c0_i32, %c0_i32_0 : i32, i32
  }
  func.func @transform_6(%arg0: i32) -> (i32, i32) {
    %c0_i32 = arith.constant 0 : i32
    %c0_i32_0 = arith.constant 0 : i32
    %c0_i32_1 = arith.constant 0 : i32
    return %c0_i32, %c0_i32_0 : i32, i32
  }
  func.func @transform_7(%arg0: i32) -> (i32, i32) {
    %c0_i32 = arith.constant 0 : i32
    %c0_i32_0 = arith.constant 0 : i32
    return %arg0, %c0_i32 : i32, i32
  }
}

</mosaic_0001>

<bundles_post_ra>
// kernel: clip_to_clap.1
= control target key start
LH: loop header
LB: loop body
LE: loop exit
PB: predicated region body
PF: predicated region fallthrough
CT: control target
= control target key end

     0   :  { %12 = vsyncpa [#allocation3], 0  ;;  %s2037_s0 = inlined_call_operand.vmem [shape: bf16[8,512], index: 0, kind: input, shape index: {}]   ;;  %s2038_s1 = inlined_call_operand.hbm [shape: bf16[512,256], index: 1, kind: input, shape index: {}]   ;;  %s2039_s2 = inlined_call_operand.vmem [shape: f32[1,256], index: 2, kind: input, shape index: {}]   ;;  %s2040_s3 = inlined_call_operand.hbm [shape: bf16[256,256], index: 3, kind: input, shape index: {}]   ;;  %s2041_s4 = inlined_call_operand.vmem [shape: f32[1,256], index: 4, kind: input, shape index: {}]   ;;  %s2042_s5 = inlined_call_operand.hbm [shape: bf16[256,512], index: 5, kind: input, shape index: {}]   ;;  %s2043_s6 = inlined_call_operand.vmem [shape: f32[1,512], index: 6, kind: input, shape index: {}]   ;;  %s2044_s7 = inlined_call_operand.hbm [shape: bf16[8,512], index: 7, kind: output, shape index: {}]  }
   0x1   :  { %13 = vsyncpa [#allocation6], 0 }
   0x2   :  { %14 = vsyncpa [#allocation4], 0  ;;  %s1877_s24 = smov [#allocation5]   ;;  %s1878_s26 = smov [#allocation2]  }
   0x3   :  { %s36_s25 = sshll.u32 %s1877_s24, 4  ;;  %s22_s27 = sshll.u32 %s1878_s26, 4  ;;  %s37_s25 = int_to_ptr.vmem [resolvable:$true] %s36_s25  ;;  %s1925_s27 = int_to_ptr.vmem [resolvable:$true] %s22_s27 }
   0x4   :  { %s1783_s30 = scalar_lea.hbm %s2040_s3, 4096 }
   0x5   :  { %p1784_p0 = scmp.ne.s32.totalorder %s2040_s3, %s1783_s30  ;;  %p1787_p1 = scmp.lt.u32.totalorder %s1783_s30, %s2040_s3 }
   0x7   :  { %p1789_p2 = pnand %p1787_p1, %p1784_p0 }
   0x9   :  { %1792 = shalt.err (!%p1789_p2)
}
   0xa   :  { %s1793_s12 = scalar_lea.vmem %s37_s25, 4096  ;;  %p1798_p4 = scmp.lt.s32.totalorder %s37_s25, %s37_s25 }
   0xb   :  { %p1794_p3 = scmp.ne.s32.totalorder %s37_s25, %s1793_s12  ;;  %p1799_p5 = scmp.lt.s32.totalorder %s1793_s12, %s1793_s12 }
   0xd   :  { %p1800_p6 = por %p1799_p5, %p1798_p4 }
   0xf   :  { %p1801_p7 = pnand %p1800_p6, %p1794_p3 }
  0x11   :  { %1804 = shalt.err (!%p1801_p7)
}
  0x12   :  { %s1879_s13 = smov 128   ;;  %s1880_s14 = smov 8  }
  0x13   :  { %42 = dma.hbm_to_vmem [thread:$0]  %s2040_s3, 4096, %s37_s25, [#allocation6], %s1879_s13, %s1879_s13, %s1880_s14  }
  0x14   :  { %s1805_s19 = scalar_lea.hbm %s2038_s1, 8192 }
  0x15   :  { %p1806_p8 = scmp.ne.s32.totalorder %s2038_s1, %s1805_s19  ;;  %p1809_p9 = scmp.lt.u32.totalorder %s1805_s19, %s2038_s1 }
  0x17   :  { %p1811_p10 = pnand %p1809_p9, %p1806_p8 }
  0x19   :  { %1814 = shalt.err (!%p1811_p10)
}
  0x1a   :  { %s1815_s24 = scalar_lea.vmem %s1925_s27, 8192  ;;  %p1820_p12 = scmp.lt.s32.totalorder %s1925_s27, %s1925_s27 }
  0x1b   :  { %p1816_p11 = scmp.ne.s32.totalorder %s1925_s27, %s1815_s24  ;;  %p1821_p13 = scmp.lt.s32.totalorder %s1815_s24, %s1815_s24 }
  0x1d   :  { %p1822_p0 = por %p1821_p13, %p1820_p12 }
  0x1f   :  { %p1823_p1 = pnand %p1822_p0, %p1816_p11 }
  0x21   :  { %1826 = shalt.err (!%p1823_p1)
}
  0x22   :  { %28 = dma.hbm_to_vmem [thread:$0]  %s2038_s1, 8192, %s1925_s27, [#allocation3], %s1879_s13, %s1879_s13, %s1880_s14  }
  0x23   :  { %s1881_s26 = smov [#allocation7]   ;;  %s1827_s8 = scalar_lea.hbm %s2042_s5, 8192 }
  0x24   :  { %s50_s28 = sshll.u32 %s1881_s26, 4  ;;  %p1828_p2 = scmp.ne.s32.totalorder %s2042_s5, %s1827_s8  ;;  %s51_s28 = int_to_ptr.vmem [resolvable:$true] %s50_s28 }
  0x25   :  { %p1831_p3 = scmp.lt.u32.totalorder %s1827_s8, %s2042_s5 }
  0x27   :  { %p1833_p4 = pnand %p1831_p3, %p1828_p2 }
  0x29   :  { %1836 = shalt.err (!%p1833_p4)
}
  0x2a   :  { %s1837_s15 = scalar_lea.vmem %s51_s28, 8192  ;;  %p1842_p6 = scmp.lt.s32.totalorder %s51_s28, %s51_s28 }
  0x2b   :  { %p1838_p5 = scmp.ne.s32.totalorder %s51_s28, %s1837_s15  ;;  %p1843_p7 = scmp.lt.s32.totalorder %s1837_s15, %s1837_s15 }
  0x2d   :  { %p1844_p8 = por %p1843_p7, %p1842_p6 }
  0x2f   :  { %p1845_p9 = pnand %p1844_p8, %p1838_p5 }
  0x31   :  { %1848 = shalt.err (!%p1845_p9)
}
  0x32   :  { %s1882_s1 = smov 256   ;;  %s1883_s27 = smov 16  }
  0x33   :  { %56 = dma.hbm_to_vmem [thread:$0]  %s2042_s5, 8192, %s51_s28, [#allocation6], %s1882_s1, %s1882_s1, %s1883_s27  }
  0x34   :  { %1871 = dma.done.wait [#allocation3], 8192  }
  0x35   :  { %1872 = vsyncadd [#allocation3], 4294959104 }
  0x36   :  { %1873 = dma.done.wait [#allocation6], 12288  }
  0x37   :  { %1874 = vsyncadd [#allocation6], 4294955008  ;;  %v68_v0 = vld [vmem:[%s2037_s0] sm:$0xff]  ;;  %v69_v1 = vld [vmem:[%s2037_s0 + $0x8] sm:$0xff] }
  0x38   :  { %v1974_v2 = vunpack.c.l.bf16 %v68_v0  ;;  %v1976_v3 = vunpack.c.h.bf16 %v68_v0  ;;  %v1978_v4 = vunpack.c.l.bf16 %v69_v1  ;;  %v1980_v5 = vunpack.c.h.bf16 %v69_v1  ;;  %v1539_v6 = vld [vmem:[#allocation2 + $0x4] ss:$8 sps:$4 sm:$0xff]   ;;  %v1541_v7 = vld [vmem:[#allocation2] ss:$8 sps:$4 sm:$0xff]   ;;  %v1542_v8 = vld [vmem:[#allocation2 + $0x14] ss:$8 sps:$4 sm:$0xff]  }
  0x39   :  { %489 = vmatprep.subr.bf16.mxu0 %v1539_v6  ;;  %v1544_v12 = vld [vmem:[#allocation2 + $0x10] ss:$8 sps:$4 sm:$0xff]   ;;  %v1545_v15 = vld [vmem:[#allocation2 + $0x24] ss:$8 sps:$4 sm:$0xff]   ;;  %v1547_v17 = vld [vmem:[#allocation2 + $0x20] ss:$8 sps:$4 sm:$0xff]  }
  0x3a   :  { %v74_v9 = vmul.f32 %v1974_v2, %v1974_v2  ;;  %v75_v10 = vmul.f32 %v1976_v3, %v1976_v3  ;;  %v76_v11 = vmul.f32 %v1978_v4, %v1978_v4  ;;  %490 = vmatpush1.bf16.msra.mxu0 %v1541_v7  ;;  %v77_v13 = vmul.f32 %v1980_v5, %v1980_v5  ;;  %v1548_v19 = vld [vmem:[#allocation2 + $0x34] ss:$8 sps:$4 sm:$0xff]   ;;  %v1550_v20 = vld [vmem:[#allocation2 + $0x30] ss:$8 sps:$4 sm:$0xff]   ;;  %v1551_v21 = vld [vmem:[#allocation2 + $0x44] ss:$8 sps:$4 sm:$0xff]  }
  0x3b   :  { %491 = vmatprep.subr.bf16.mxu0 %v1542_v8  ;;  %v1553_v22 = vld [vmem:[#allocation2 + $0x40] ss:$8 sps:$4 sm:$0xff]   ;;  %v1554_v23 = vld [vmem:[#allocation2 + $0x54] ss:$8 sps:$4 sm:$0xff]   ;;  %v1556_v24 = vld [vmem:[#allocation2 + $0x50] ss:$8 sps:$4 sm:$0xff]  }
  0x3c   :  { %v78_v14 = vadd.f32 %v75_v10, %v74_v9  ;;  %v1557_v25 = vld [vmem:[#allocation2 + $0x64] ss:$8 sps:$4 sm:$0xff]   ;;  %v1559_v26 = vld [vmem:[#allocation2 + $0x60] ss:$8 sps:$4 sm:$0xff]   ;;  %v1560_v27 = vld [vmem:[#allocation2 + $0x74] ss:$8 sps:$4 sm:$0xff]  }
  0x3d   :  { %v1562_v28 = vld [vmem:[#allocation2 + $0x70] ss:$8 sps:$4 sm:$0xff]   ;;  %v1563_v29 = vld [vmem:[#allocation2 + $0x84] ss:$8 sps:$4 sm:$0xff]   ;;  %v1565_v30 = vld [vmem:[#allocation2 + $0x80] ss:$8 sps:$4 sm:$0xff]  }
  0x3e   :  { %v79_v16 = vadd.f32 %v78_v14, %v76_v11  ;;  %492 = vmatpush1.bf16.msra.mxu0 %v1544_v12  ;;  %v1566_v31 = vld [vmem:[#allocation2 + $0x94] ss:$8 sps:$4 sm:$0xff]   ;;  %v1568_v32 = vld [vmem:[#allocation2 + $0x90] ss:$8 sps:$4 sm:$0xff]   ;;  %v1569_v33 = vld [vmem:[#allocation2 + $0xa4] ss:$8 sps:$4 sm:$0xff]  }
  0x3f   :  { %493 = vmatprep.subr.bf16.mxu0 %v1545_v15  ;;  %v1571_v34 = vld [vmem:[#allocation2 + $0xa0] ss:$8 sps:$4 sm:$0xff]   ;;  %v1572_v35 = vld [vmem:[#allocation2 + $0xb4] ss:$8 sps:$4 sm:$0xff]   ;;  %v1574_v36 = vld [vmem:[#allocation2 + $0xb0] ss:$8 sps:$4 sm:$0xff]  }
  0x40   :  { %v80_v18 = vadd.f32 %v79_v16, %v77_v13  ;;  %v1575_v37 = vld [vmem:[#allocation2 + $0xc4] ss:$8 sps:$4 sm:$0xff]   ;;  %v1577_v38 = vld [vmem:[#allocation2 + $0xc0] ss:$8 sps:$4 sm:$0xff]   ;;  %v1578_v39 = vld [vmem:[#allocation2 + $0xd4] ss:$8 sps:$4 sm:$0xff]  }
  0x41   :  { %v1580_v40 = vld [vmem:[#allocation2 + $0xd0] ss:$8 sps:$4 sm:$0xff]   ;;  %v1581_v41 = vld [vmem:[#allocation2 + $0xe4] ss:$8 sps:$4 sm:$0xff]   ;;  %v1583_v42 = vld [vmem:[#allocation2 + $0xe0] ss:$8 sps:$4 sm:$0xff]  }
  0x42   :  { %81 = vadd.xlane.f32.xlu0 %v80_v18  ;;  %494 = vmatpush1.bf16.msra.mxu0 %v1547_v17  ;;  %v1584_v43 = vld [vmem:[#allocation2 + $0xf4] ss:$8 sps:$4 sm:$0xff]   ;;  %v1586_v44 = vld [vmem:[#allocation2 + $0xf0] ss:$8 sps:$4 sm:$0xff]   ;;  %v1589_v45 = vld [vmem:[#allocation2 + $0x104] ss:$8 sps:$4 sm:$0xff]  }
  0x43   :  { %495 = vmatprep.subr.bf16.mxu0 %v1548_v19  ;;  %v1635_v46 = vld [vmem:[#allocation5 + $0x4] ss:$8 sps:$4 sm:$0xff]   ;;  %v1637_v47 = vld [vmem:[#allocation5] ss:$8 sps:$4 sm:$0xff]   ;;  %v1638_v48 = vld [vmem:[#allocation5 + $0x14] ss:$8 sps:$4 sm:$0xff]  }
  0x44   :  { %779 = vmatprep.subr.bf16.mxu1 %v1635_v46  ;;  %v1640_v49 = vld [vmem:[#allocation5 + $0x10] ss:$8 sps:$4 sm:$0xff]   ;;  %v1641_v50 = vld [vmem:[#allocation5 + $0x24] ss:$8 sps:$4 sm:$0xff]   ;;  %v1643_v51 = vld [vmem:[#allocation5 + $0x20] ss:$8 sps:$4 sm:$0xff]  }
  0x45   :  { %780 = vmatpush1.bf16.msra.mxu1 %v1637_v47  ;;  %v1644_v52 = vld [vmem:[#allocation5 + $0x34] ss:$8 sps:$4 sm:$0xff]   ;;  %v1646_v53 = vld [vmem:[#allocation5 + $0x30] ss:$8 sps:$4 sm:$0xff]   ;;  %v1647_v54 = vld [vmem:[#allocation5 + $0x44] ss:$8 sps:$4 sm:$0xff]  }
  0x46   :  { %496 = vmatpush1.bf16.msra.mxu0 %v1550_v20  ;;  %781 = vmatprep.subr.bf16.mxu1 %v1638_v48  ;;  %v1649_v55 = vld [vmem:[#allocation5 + $0x40] ss:$8 sps:$4 sm:$0xff]   ;;  %v1650_v56 = vld [vmem:[#allocation5 + $0x54] ss:$8 sps:$4 sm:$0xff]   ;;  %v1652_v57 = vld [vmem:[#allocation5 + $0x50] ss:$8 sps:$4 sm:$0xff]  }
  0x47   :  { %497 = vmatprep.subr.bf16.mxu0 %v1551_v21  ;;  %v1653_v58 = vld [vmem:[#allocation5 + $0x64] ss:$8 sps:$4 sm:$0xff]   ;;  %v1655_v59 = vld [vmem:[#allocation5 + $0x60] ss:$8 sps:$4 sm:$0xff]   ;;  %v1656_v60 = vld [vmem:[#allocation5 + $0x74] ss:$8 sps:$4 sm:$0xff]  }
  0x48   :  { %v1658_v61 = vld [vmem:[#allocation5 + $0x70] ss:$8 sps:$4 sm:$0xff]   ;;  %v1659_v62 = vld [vmem:[#allocation5 + $0x84] ss:$8 sps:$4 sm:$0xff]   ;;  %v1661_v63 = vld [vmem:[#allocation5 + $0x80] ss:$8 sps:$4 sm:$0xff]  }
  0x49   :  { %782 = vmatpush1.bf16.msra.mxu1 %v1640_v49  ;;  %v1662_v0 = vld [vmem:[#allocation5 + $0x94] ss:$8 sps:$4 sm:$0xff]   ;;  %v1664_v1 = vld [vmem:[#allocation5 + $0x90] ss:$8 sps:$4 sm:$0xff]   ;;  %v1665_v6 = vld [vmem:[#allocation5 + $0xa4] ss:$8 sps:$4 sm:$0xff]  }
  0x4a   :  { %498 = vmatpush1.bf16.msra.mxu0 %v1553_v22  ;;  %783 = vmatprep.subr.bf16.mxu1 %v1641_v50  ;;  %v1667_v7 = vld [vmem:[#allocation5 + $0xa0] ss:$8 sps:$4 sm:$0xff]   ;;  %v1668_v8 = vld [vmem:[#allocation5 + $0xb4] ss:$8 sps:$4 sm:$0xff]   ;;  %v1670_v9 = vld [vmem:[#allocation5 + $0xb0] ss:$8 sps:$4 sm:$0xff]  }
  0x4b   :  { %499 = vmatprep.subr.bf16.mxu0 %v1554_v23  ;;  %v1671_v10 = vld [vmem:[#allocation5 + $0xc4] ss:$8 sps:$4 sm:$0xff]   ;;  %v1673_v13 = vld [vmem:[#allocation5 + $0xc0] ss:$8 sps:$4 sm:$0xff]   ;;  %v1674_v14 = vld [vmem:[#allocation5 + $0xd4] ss:$8 sps:$4 sm:$0xff]  }
  0x4c   :  { %v1676_v15 = vld [vmem:[#allocation5 + $0xd0] ss:$8 sps:$4 sm:$0xff]   ;;  %v1587_v21 = vld [vmem:[#allocation2 + $0x100] ss:$8 sps:$4 sm:$0xff]   ;;  %v1592_v23 = vld [vmem:[#allocation2 + $0x114] ss:$8 sps:$4 sm:$0xff]  }
  0x4d   :  { %784 = vmatpush1.bf16.msra.mxu1 %v1643_v51  ;;  %v1626_v46 = vld [vmem:[#allocation2 + $0x1d0] ss:$8 sps:$4 sm:$0xff]   ;;  %v1631_v47 = vld [vmem:[#allocation2 + $0x1e4] ss:$8 sps:$4 sm:$0xff]   ;;  %v1629_v48 = vld [vmem:[#allocation2 + $0x1e0] ss:$8 sps:$4 sm:$0xff]  }
  0x4e   :  { %500 = vmatpush1.bf16.msra.mxu0 %v1556_v24  ;;  %785 = vmatprep.subr.bf16.mxu1 %v1644_v52  ;;  %v1634_v49 = vld [vmem:[#allocation2 + $0x1f4] ss:$8 sps:$4 sm:$0xff]   ;;  %v1632_v50 = vld [vmem:[#allocation2 + $0x1f0] ss:$8 sps:$4 sm:$0xff]  }
  0x4f   :  { %501 = vmatprep.subr.bf16.mxu0 %v1557_v25  ;;  %v1590_v25 = vld [vmem:[#allocation2 + $0x110] ss:$8 sps:$4 sm:$0xff]  }
  0x51   :  { %786 = vmatpush1.bf16.msra.mxu1 %v1646_v53  ;;  %v1677_v53 = vld [vmem:[#allocation5 + $0xe4] ss:$8 sps:$4 sm:$0xff]  }
  0x52   :  { %502 = vmatpush1.bf16.msra.mxu0 %v1559_v26  ;;  %787 = vmatprep.subr.bf16.mxu1 %v1647_v54  ;;  %v1595_v26 = vld [vmem:[#allocation2 + $0x124] ss:$8 sps:$4 sm:$0xff]   ;;  %v1679_v54 = vld [vmem:[#allocation5 + $0xe0] ss:$8 sps:$4 sm:$0xff]  }
  0x53   :  { %503 = vmatprep.subr.bf16.mxu0 %v1560_v27  ;;  %v1598_v27 = vld [vmem:[#allocation2 + $0x134] ss:$8 sps:$4 sm:$0xff]  }
  0x55   :  { %788 = vmatpush1.bf16.msra.mxu1 %v1649_v55  ;;  %v1680_v55 = vld [vmem:[#allocation5 + $0xf4] ss:$8 sps:$4 sm:$0xff]  }
  0x56   :  { %504 = vmatpush1.bf16.msra.mxu0 %v1562_v28  ;;  %789 = vmatprep.subr.bf16.mxu1 %v1650_v56  ;;  %v1599_v28 = vld [vmem:[#allocation2 + $0x140] ss:$8 sps:$4 sm:$0xff]   ;;  %v1682_v56 = vld [vmem:[#allocation5 + $0xf0] ss:$8 sps:$4 sm:$0xff]  }
  0x57   :  { %505 = vmatprep.subr.bf16.mxu0 %v1563_v29  ;;  %v1604_v29 = vld [vmem:[#allocation2 + $0x154] ss:$8 sps:$4 sm:$0xff]  }
  0x59   :  { %790 = vmatpush1.bf16.msra.mxu1 %v1652_v57  ;;  %v1685_v57 = vld [vmem:[#allocation7 + $0x4] ss:$16 sps:$4 sm:$0xff]  }
  0x5a   :  { %506 = vmatpush1.bf16.msra.mxu0 %v1565_v30  ;;  %791 = vmatprep.subr.bf16.mxu1 %v1653_v58  ;;  %v1602_v30 = vld [vmem:[#allocation2 + $0x150] ss:$8 sps:$4 sm:$0xff]  }
  0x5b   :  { %507 = vmatprep.subr.bf16.mxu0 %v1566_v31  ;;  %v1607_v31 = vld [vmem:[#allocation2 + $0x164] ss:$8 sps:$4 sm:$0xff]   ;;  %v1686_v58 = vld [vmem:[#allocation7 + $0x8] ss:$16 sps:$4 sm:$0xff]  }
  0x5d   :  { %792 = vmatpush1.bf16.msra.mxu1 %v1655_v59  ;;  %v1688_v59 = vld [vmem:[#allocation7 + $0xc] ss:$16 sps:$4 sm:$0xff]  }
  0x5e   :  { %508 = vmatpush1.bf16.msra.mxu0 %v1568_v32  ;;  %793 = vmatprep.subr.bf16.mxu1 %v1656_v60  ;;  %v1605_v32 = vld [vmem:[#allocation2 + $0x160] ss:$8 sps:$4 sm:$0xff]   ;;  %v1694_v60 = vld [vmem:[#allocation7 + $0x2c] ss:$16 sps:$4 sm:$0xff]  }
  0x5f   :  { %509 = vmatprep.subr.bf16.mxu0 %v1569_v33  ;;  %v1610_v33 = vld [vmem:[#allocation2 + $0x174] ss:$8 sps:$4 sm:$0xff]  }
  0x61   :  { %794 = vmatpush1.bf16.msra.mxu1 %v1658_v61  ;;  %v1692_v61 = vld [vmem:[#allocation7 + $0x28] ss:$16 sps:$4 sm:$0xff]  }
  0x62   :  { %510 = vmatpush1.bf16.msra.mxu0 %v1571_v34  ;;  %795 = vmatprep.subr.bf16.mxu1 %v1659_v62  ;;  %v1608_v34 = vld [vmem:[#allocation2 + $0x170] ss:$8 sps:$4 sm:$0xff]  }
  0x63   :  { %511 = vmatprep.subr.bf16.mxu0 %v1572_v35  ;;  %v1613_v35 = vld [vmem:[#allocation2 + $0x184] ss:$8 sps:$4 sm:$0xff]   ;;  %v1698_v62 = vld [vmem:[#allocation7 + $0x48] ss:$16 sps:$4 sm:$0xff]  }
  0x65   :  { %796 = vmatpush1.bf16.msra.mxu1 %v1661_v63  ;;  %v1706_v63 = vld [vmem:[#allocation7 + $0x6c] ss:$16 sps:$4 sm:$0xff]  }
  0x66   :  { %512 = vmatpush1.bf16.msra.mxu0 %v1574_v36  ;;  %797 = vmatprep.subr.bf16.mxu1 %v1662_v0  ;;  %v1611_v36 = vld [vmem:[#allocation2 + $0x180] ss:$8 sps:$4 sm:$0xff]  }
  0x67   :  { %513 = vmatprep.subr.bf16.mxu0 %v1575_v37  ;;  %v1616_v37 = vld [vmem:[#allocation2 + $0x194] ss:$8 sps:$4 sm:$0xff]   ;;  %v1704_v0 = vld [vmem:[#allocation7 + $0x68] ss:$16 sps:$4 sm:$0xff]  }
  0x69   :  { %798 = vmatpush1.bf16.msra.mxu1 %v1664_v1  ;;  %v1712_v1 = vld [vmem:[#allocation7 + $0x8c] ss:$16 sps:$4 sm:$0xff]  }
  0x6a   :  { %514 = vmatpush1.bf16.msra.mxu0 %v1577_v38  ;;  %799 = vmatprep.subr.bf16.mxu1 %v1665_v6  ;;  %v1614_v38 = vld [vmem:[#allocation2 + $0x190] ss:$8 sps:$4 sm:$0xff]  }
  0x6b   :  { %515 = vmatprep.subr.bf16.mxu0 %v1578_v39  ;;  %v1619_v39 = vld [vmem:[#allocation2 + $0x1a4] ss:$8 sps:$4 sm:$0xff]   ;;  %v1710_v6 = vld [vmem:[#allocation7 + $0x88] ss:$16 sps:$4 sm:$0xff]  }
  0x6d   :  { %800 = vmatpush1.bf16.msra.mxu1 %v1667_v7  ;;  %v1718_v7 = vld [vmem:[#allocation7 + $0xac] ss:$16 sps:$4 sm:$0xff]  }
  0x6e   :  { %516 = vmatpush1.bf16.msra.mxu0 %v1580_v40  ;;  %801 = vmatprep.subr.bf16.mxu1 %v1668_v8  ;;  %v1617_v40 = vld [vmem:[#allocation2 + $0x1a0] ss:$8 sps:$4 sm:$0xff]  }
  0x6f   :  { %517 = vmatprep.subr.bf16.mxu0 %v1581_v41  ;;  %v1622_v41 = vld [vmem:[#allocation2 + $0x1b4] ss:$8 sps:$4 sm:$0xff]   ;;  %v1716_v8 = vld [vmem:[#allocation7 + $0xa8] ss:$16 sps:$4 sm:$0xff]  }
  0x71   :  { %802 = vmatpush1.bf16.msra.mxu1 %v1670_v9  ;;  %v1724_v9 = vld [vmem:[#allocation7 + $0xcc] ss:$16 sps:$4 sm:$0xff]  }
  0x72   :  { %518 = vmatpush1.bf16.msra.mxu0 %v1583_v42  ;;  %803 = vmatprep.subr.bf16.mxu1 %v1671_v10  ;;  %v1620_v42 = vld [vmem:[#allocation2 + $0x1b0] ss:$8 sps:$4 sm:$0xff]  }
  0x73   :  { %519 = vmatprep.subr.bf16.mxu0 %v1584_v43  ;;  %v1625_v43 = vld [vmem:[#allocation2 + $0x1c4] ss:$8 sps:$4 sm:$0xff]   ;;  %v1722_v10 = vld [vmem:[#allocation7 + $0xc8] ss:$16 sps:$4 sm:$0xff]  }
  0x75   :  { %804 = vmatpush1.bf16.msra.mxu1 %v1673_v13  ;;  %v1736_v13 = vld [vmem:[#allocation7 + $0x10c] ss:$16 sps:$4 sm:$0xff]  }
  0x76   :  { %520 = vmatpush1.bf16.msra.mxu0 %v1586_v44  ;;  %805 = vmatprep.subr.bf16.mxu1 %v1674_v14  ;;  %v1623_v44 = vld [vmem:[#allocation2 + $0x1c0] ss:$8 sps:$4 sm:$0xff]  }
  0x77   :  { %530 = vmatprep.subr.bf16.mxu0 %v1589_v45  ;;  %v1628_v45 = vld [vmem:[#allocation2 + $0x1d4] ss:$8 sps:$4 sm:$0xff]   ;;  %v1734_v14 = vld [vmem:[#allocation7 + $0x108] ss:$16 sps:$4 sm:$0xff]  }
  0x79   :  { %806 = vmatpush1.bf16.msra.mxu1 %v1676_v15  ;;  %v1742_v15 = vld [vmem:[#allocation7 + $0x12c] ss:$16 sps:$4 sm:$0xff]  }
  0x7a   :  { %807 = vmatprep.subr.bf16.mxu1 %v1677_v53  ;;  %v1725_v53 = vld [vmem:[#allocation7 + $0xe0] ss:$16 sps:$4 sm:$0xff]  }
  0x7d   :  { %808 = vmatpush1.bf16.msra.mxu1 %v1679_v54  ;;  %v1733_v54 = vld [vmem:[#allocation7 + $0x104] ss:$16 sps:$4 sm:$0xff]  }
  0x7e   :  { %809 = vmatprep.subr.bf16.mxu1 %v1680_v55  ;;  %v1731_v55 = vld [vmem:[#allocation7 + $0x100] ss:$16 sps:$4 sm:$0xff]  }
  0x81   :  { %810 = vmatpush1.bf16.msra.mxu1 %v1682_v56  ;;  %v1739_v56 = vld [vmem:[#allocation7 + $0x124] ss:$16 sps:$4 sm:$0xff]  }
  0x82   :  { %1230 = vmatprep.subr.bf16.mxu1 %v1685_v57  ;;  %v1737_v57 = vld [vmem:[#allocation7 + $0x120] ss:$16 sps:$4 sm:$0xff]  }
  0xcf   :  { %v82_v11 = vpop.xlane.xlu0 %81 }
  0xd0   :  { %v83_v12 = vmax.f32 %v82_v11, 1e-24  ;;  %v1730_v11 = vld [vmem:[#allocation7 + $0xec] ss:$16 sps:$4 sm:$0xff]  }
  0xd2   :  { %1779 = vrsqrt.f32 %v83_v12  ;;  %v1728_v12 = vld [vmem:[#allocation7 + $0xe8] ss:$16 sps:$4 sm:$0xff]  }
  0xdc   :  { %v1990_v16 = vpop.eup %1779 }
  0xdd   :  { %v86_v17 = vmul.f32 %v1990_v16, %v1976_v3  ;;  %v85_v18 = vmul.f32 %v1990_v16, %v1974_v2  ;;  %v88_v19 = vmul.f32 %v1990_v16, %v1980_v5  ;;  %v1593_v3 = vld [vmem:[#allocation2 + $0x120] ss:$8 sps:$4 sm:$0xff]   ;;  %v1596_v2 = vld [vmem:[#allocation2 + $0x130] ss:$8 sps:$4 sm:$0xff]   ;;  %v1601_v5 = vld [vmem:[#allocation2 + $0x144] ss:$8 sps:$4 sm:$0xff]   ;;  %v87_v51 = vmul.f32 %v1990_v16, %v1978_v4 }
  0xde   :  { %v1700_v4 = vld [vmem:[#allocation7 + $0x4c] ss:$16 sps:$4 sm:$0xff]   ;;  %v1740_v16 = vld [vmem:[#allocation7 + $0x128] ss:$16 sps:$4 sm:$0xff]  }
  0xdf   :  { %v90_v20 = vpack.c.bf16 %v86_v17, %v86_v17  ;;  %v89_v22 = vpack.c.bf16 %v85_v18, %v85_v18  ;;  %v92_v24 = vpack.c.bf16 %v88_v19, %v88_v19  ;;  %v91_v52 = vpack.c.bf16 %v87_v51, %v87_v51  ;;  %v1748_v17 = vld [vmem:[#allocation7 + $0x14c] ss:$16 sps:$4 sm:$0xff]   ;;  %v1746_v18 = vld [vmem:[#allocation7 + $0x148] ss:$16 sps:$4 sm:$0xff]   ;;  %v1719_v51 = vld [vmem:[#allocation7 + $0xc0] ss:$16 sps:$4 sm:$0xff]  }
  0xe0   :  { %v1754_v19 = vld [vmem:[#allocation7 + $0x16c] ss:$16 sps:$4 sm:$0xff]  }
  0xe1   :  { %521 = vmatprep.mubr.bf16.mxu0 %v90_v20  ;;  %v1752_v20 = vld [vmem:[#allocation7 + $0x168] ss:$16 sps:$4 sm:$0xff]  }
  0xe2   :  { %522 = vmatmul.mubr.bf16.vlgmr.msra.gmra.mrb[0].mxu0 %v89_v22  ;;  %v1758_v22 = vld [vmem:[#allocation7 + $0x188] ss:$16 sps:$4 sm:$0xff]  }
  0xe3   :  { %531 = vmatpush1.bf16.msra.mxu0 %v1587_v21  ;;  %562 = vmatprep.mubr.bf16.mxu0 %v92_v24  ;;  %v1760_v21 = vld [vmem:[#allocation7 + $0x18c] ss:$16 sps:$4 sm:$0xff]   ;;  %v1764_v24 = vld [vmem:[#allocation7 + $0x1a8] ss:$16 sps:$4 sm:$0xff]  }
  0xe4   :  { %532 = vmatprep.subr.bf16.mxu0 %v1592_v23  ;;  %v1766_v23 = vld [vmem:[#allocation7 + $0x1ac] ss:$16 sps:$4 sm:$0xff]  }
  0xe7   :  { %533 = vmatpush1.bf16.msra.mxu0 %v1590_v25  ;;  %v159_v25 = vlaneseq }
  0xe8   :  { %534 = vmatprep.subr.bf16.mxu0 %v1595_v26 }
  0xe9   :  { %v2000_v26 = vshrl.u32 %v159_v25, 7 }
  0xeb   :  { %535 = vmatpush1.bf16.msra.mxu0 %v1593_v3  ;;  %v2003_v3 = vsub.s32 0, %v2000_v26 }
  0xec   :  { %536 = vmatprep.subr.bf16.mxu0 %v1598_v27  ;;  %v157_v27 = vld [vmem:[%s2039_s2] sm:$0x3] }
  0xef   :  { %537 = vmatpush1.bf16.msra.mxu0 %v1596_v2  ;;  %v2009_v2 = vsub.s32 1, %v2000_v26 }
  0xf0   :  { %538 = vmatprep.subr.bf16.mxu0 %v1601_v5  ;;  %v162_v5 = vrot.slane %v157_v27, %v2003_v3 }
  0xf3   :  { %539 = vmatpush1.bf16.msra.mxu0 %v1599_v28  ;;  %v166_v28 = vrot.slane %v157_v27, %v2009_v2  ;;  %v888_v27 = vld [vmem:[%s2043_s6] sm:$0xf]  ;;  %s1884_s6 = smov [#allocation8]  }
  0xf4   :  { %540 = vmatprep.subr.bf16.mxu0 %v1604_v29  ;;  %s1351_s22 = sshll.u32 %s1884_s6, 4  ;;  %s1352_s22 = int_to_ptr.vmem [resolvable:$true] %s1351_s22 }
  0xf5   :  { %s1849_s23 = scalar_lea.vmem %s1352_s22, 256  ;;  %p1854_p11 = scmp.lt.s32.totalorder %s1352_s22, %s1352_s22 }
  0xf6   :  { %p1850_p10 = scmp.ne.s32.totalorder %s1352_s22, %s1849_s23  ;;  %p1855_p12 = scmp.lt.s32.totalorder %s1849_s23, %s1849_s23 }
  0xf7   :  { %541 = vmatpush1.bf16.msra.mxu0 %v1602_v30 }
  0xf8   :  { %542 = vmatprep.subr.bf16.mxu0 %v1607_v31  ;;  %p1856_p13 = por %p1855_p12, %p1854_p11 }
  0xfa   :  { %p1857_p0 = pnand %p1856_p13, %p1850_p10 }
  0xfb   :  { %543 = vmatpush1.bf16.msra.mxu0 %v1605_v32 }
  0xfc   :  { %544 = vmatprep.subr.bf16.mxu0 %v1610_v33 }
  0xff   :  { %545 = vmatpush1.bf16.msra.mxu0 %v1608_v34 }
 0x100   :  { %546 = vmatprep.subr.bf16.mxu0 %v1613_v35 }
 0x103   :  { %547 = vmatpush1.bf16.msra.mxu0 %v1611_v36 }
 0x104   :  { %548 = vmatprep.subr.bf16.mxu0 %v1616_v37 }
 0x107   :  { %549 = vmatpush1.bf16.msra.mxu0 %v1614_v38  ;;  %v1683_v38 = vld [vmem:[#allocation7] ss:$16 sps:$4 sm:$0xff]  }
 0x108   :  { %550 = vmatprep.subr.bf16.mxu0 %v1619_v39 }
 0x10b   :  { %551 = vmatpush1.bf16.msra.mxu0 %v1617_v40  ;;  %v1691_v40 = vld [vmem:[#allocation7 + $0x24] ss:$16 sps:$4 sm:$0xff]  }
 0x10c   :  { %552 = vmatprep.subr.bf16.mxu0 %v1622_v41  ;;  %v1689_v41 = vld [vmem:[#allocation7 + $0x20] ss:$16 sps:$4 sm:$0xff]  }
 0x10f   :  { %553 = vmatpush1.bf16.msra.mxu0 %v1620_v42  ;;  %v1697_v42 = vld [vmem:[#allocation7 + $0x44] ss:$16 sps:$4 sm:$0xff]  }
 0x110   :  { %554 = vmatprep.subr.bf16.mxu0 %v1625_v43  ;;  %v1695_v43 = vld [vmem:[#allocation7 + $0x40] ss:$16 sps:$4 sm:$0xff]  }
 0x113   :  { %555 = vmatpush1.bf16.msra.mxu0 %v1623_v44  ;;  %v1703_v44 = vld [vmem:[#allocation7 + $0x64] ss:$16 sps:$4 sm:$0xff]  }
 0x114   :  { %556 = vmatprep.subr.bf16.mxu0 %v1628_v45  ;;  %v1701_v45 = vld [vmem:[#allocation7 + $0x60] ss:$16 sps:$4 sm:$0xff]  }
 0x117   :  { %557 = vmatpush1.bf16.msra.mxu0 %v1626_v46  ;;  %v1709_v46 = vld [vmem:[#allocation7 + $0x84] ss:$16 sps:$4 sm:$0xff]  }
 0x118   :  { %558 = vmatprep.subr.bf16.mxu0 %v1631_v47  ;;  %v1707_v47 = vld [vmem:[#allocation7 + $0x80] ss:$16 sps:$4 sm:$0xff]  }
 0x11b   :  { %559 = vmatpush1.bf16.msra.mxu0 %v1629_v48  ;;  %v1715_v48 = vld [vmem:[#allocation7 + $0xa4] ss:$16 sps:$4 sm:$0xff]  }
 0x11c   :  { %560 = vmatprep.subr.bf16.mxu0 %v1634_v49  ;;  %v1713_v49 = vld [vmem:[#allocation7 + $0xa0] ss:$16 sps:$4 sm:$0xff]  }
 0x11f   :  { %561 = vmatpush1.bf16.msra.mxu0 %v1632_v50  ;;  %v1721_v50 = vld [vmem:[#allocation7 + $0xc4] ss:$16 sps:$4 sm:$0xff]  }
 0x120   :  { %1271 = vmatprep.subr.bf16.mxu0 %v1688_v59  ;;  %v1743_v59 = vld [vmem:[#allocation7 + $0x140] ss:$16 sps:$4 sm:$0xff]  }
 0x122   :  { %563 = vmatmul.mubr.bf16.vlgmr.msra.gmra.mrb[0].mxu0 %v91_v52  ;;  %v1727_v52 = vld [vmem:[#allocation7 + $0xe4] ss:$16 sps:$4 sm:$0xff]  }
 0x123   :  { %1272 = vmatpush1.bf16.msra.mxu0 %v1686_v58  ;;  %v1745_v58 = vld [vmem:[#allocation7 + $0x144] ss:$16 sps:$4 sm:$0xff]  }
 0x124   :  { %1273 = vmatprep.subr.bf16.mxu0 %v1694_v60  ;;  %v1751_v60 = vld [vmem:[#allocation7 + $0x164] ss:$16 sps:$4 sm:$0xff]  }
 0x127   :  { %1274 = vmatpush1.bf16.msra.mxu0 %v1692_v61  ;;  %v1749_v61 = vld [vmem:[#allocation7 + $0x160] ss:$16 sps:$4 sm:$0xff]  }
 0x128   :  { %1275 = vmatprep.subr.bf16.mxu0 %v1700_v4  ;;  %v1757_v4 = vld [vmem:[#allocation7 + $0x184] ss:$16 sps:$4 sm:$0xff]  }
 0x12b   :  { %1276 = vmatpush1.bf16.msra.mxu0 %v1698_v62  ;;  %v1755_v62 = vld [vmem:[#allocation7 + $0x180] ss:$16 sps:$4 sm:$0xff]  }
 0x12c   :  { %1277 = vmatprep.subr.bf16.mxu0 %v1706_v63  ;;  %v1763_v63 = vld [vmem:[#allocation7 + $0x1a4] ss:$16 sps:$4 sm:$0xff]  }
 0x12f   :  { %1278 = vmatpush1.bf16.msra.mxu0 %v1704_v0  ;;  %v1761_v0 = vld [vmem:[#allocation7 + $0x1a0] ss:$16 sps:$4 sm:$0xff]  }
 0x130   :  { %1279 = vmatprep.subr.bf16.mxu0 %v1712_v1  ;;  %v1769_v1 = vld [vmem:[#allocation7 + $0x1c4] ss:$16 sps:$4 sm:$0xff]  }
 0x133   :  { %1280 = vmatpush1.bf16.msra.mxu0 %v1710_v6  ;;  %v1772_v6 = vld [vmem:[#allocation7 + $0x1cc] ss:$16 sps:$4 sm:$0xff]  }
 0x134   :  { %1281 = vmatprep.subr.bf16.mxu0 %v1718_v7  ;;  %v1767_v7 = vld [vmem:[#allocation7 + $0x1c0] ss:$16 sps:$4 sm:$0xff]  }
 0x137   :  { %1282 = vmatpush1.bf16.msra.mxu0 %v1716_v8  ;;  %v1770_v8 = vld [vmem:[#allocation7 + $0x1c8] ss:$16 sps:$4 sm:$0xff]  }
 0x138   :  { %1283 = vmatprep.subr.bf16.mxu0 %v1724_v9  ;;  %v1775_v9 = vld [vmem:[#allocation7 + $0x1e4] ss:$16 sps:$4 sm:$0xff]  }
 0x13b   :  { %1284 = vmatpush1.bf16.msra.mxu0 %v1722_v10  ;;  %v1778_v10 = vld [vmem:[#allocation7 + $0x1ec] ss:$16 sps:$4 sm:$0xff]  }
 0x13c   :  { %1285 = vmatprep.subr.bf16.mxu0 %v1730_v11  ;;  %v1773_v11 = vld [vmem:[#allocation7 + $0x1e0] ss:$16 sps:$4 sm:$0xff]  }
 0x13f   :  { %1286 = vmatpush1.bf16.msra.mxu0 %v1728_v12  ;;  %v1776_v12 = vld [vmem:[#allocation7 + $0x1e8] ss:$16 sps:$4 sm:$0xff]  }
 0x140   :  { %1287 = vmatprep.subr.bf16.mxu0 %v1736_v13  ;;  %v607_v13 = vld [vmem:[%s2041_s4] sm:$0x3] }
 0x143   :  { %1288 = vmatpush1.bf16.msra.mxu0 %v1734_v14  ;;  %v612_v14 = vrot.slane %v607_v13, %v2003_v3 }
 0x144   :  { %1289 = vmatprep.subr.bf16.mxu0 %v1742_v15  ;;  %v616_v15 = vrot.slane %v607_v13, %v2009_v2 }
 0x147   :  { %1290 = vmatpush1.bf16.msra.mxu0 %v1740_v16 }
 0x148   :  { %1291 = vmatprep.subr.bf16.mxu0 %v1748_v17 }
 0x14b   :  { %1292 = vmatpush1.bf16.msra.mxu0 %v1746_v18 }
 0x14c   :  { %1293 = vmatprep.subr.bf16.mxu0 %v1754_v19 }
 0x14f   :  { %1294 = vmatpush1.bf16.msra.mxu0 %v1752_v20 }
 0x150   :  { %1295 = vmatprep.subr.bf16.mxu0 %v1760_v21 }
 0x153   :  { %1296 = vmatpush1.bf16.msra.mxu0 %v1758_v22 }
 0x154   :  { %1297 = vmatprep.subr.bf16.mxu0 %v1766_v23 }
 0x157   :  { %1298 = vmatpush1.bf16.msra.mxu0 %v1764_v24 }
 0x158   :  { %1299 = vmatprep.subr.bf16.mxu0 %v1772_v6 }
 0x15b   :  { %1300 = vmatpush1.bf16.msra.mxu0 %v1770_v8 }
 0x15c   :  { %1301 = vmatprep.subr.bf16.mxu0 %v1778_v10 }
 0x15f   :  { %1302 = vmatpush1.bf16.msra.mxu0 %v1776_v12 }
 0x1f5   :  { %v564_v29 = vpop.f32.mrb[0].mxu0 }
 0x1f6   :  { %v1525_v30 = vadd.f32 %v564_v29, %v162_v5  ;;  %v566_v31 = vpop.f32.mrb[1].mxu0  ;;  %v900_v5 = vsub.s32 2, %v2000_v26  ;;  %v893_v29 = vrot.slane %v888_v27, %v2003_v3 }
 0x1f7   :  { %v1526_v32 = vadd.f32 %v566_v31, %v166_v28  ;;  %v568_v33 = vpop.f32.mrb[2].mxu0  ;;  %v904_v28 = vsub.s32 3, %v2000_v26  ;;  %v897_v31 = vrot.slane %v888_v27, %v2009_v2 }
 0x1f8   :  { %v571_v34 = vmax.f32 %v1525_v30, 0.0  ;;  %v569_v35 = vpop.f32.mrb[3].mxu0  ;;  %v901_v30 = vrot.slane %v888_v27, %v900_v5 }
 0x1f9   :  { %v572_v36 = vmax.f32 %v1526_v32, 0.0 }
 0x1fa   :  { %v573_v39 = vpack.c.bf16 %v571_v34, %v571_v34  ;;  %v905_v34 = vrot.slane %v888_v27, %v904_v28 }
 0x1fb   :  { %v574_v37 = vpack.c.bf16 %v572_v36, %v572_v36 }
 0x1fd   :  { %811 = vmatprep.mubr.bf16.mxu1 %v574_v37 }
 0x1fe   :  { %812 = vmatmul.mubr.bf16.vlgmr.msra.gmra.mrb[0].mxu1 %v573_v39 }
 0x1ff   :  { %1231 = vmatpush1.bf16.msra.mxu1 %v1683_v38 }
 0x200   :  { %1232 = vmatprep.subr.bf16.mxu1 %v1691_v40 }
 0x203   :  { %1233 = vmatpush1.bf16.msra.mxu1 %v1689_v41 }
 0x204   :  { %1234 = vmatprep.subr.bf16.mxu1 %v1697_v42 }
 0x207   :  { %1235 = vmatpush1.bf16.msra.mxu1 %v1695_v43 }
 0x208   :  { %1236 = vmatprep.subr.bf16.mxu1 %v1703_v44 }
 0x20b   :  { %1237 = vmatpush1.bf16.msra.mxu1 %v1701_v45 }
 0x20c   :  { %1238 = vmatprep.subr.bf16.mxu1 %v1709_v46 }
 0x20f   :  { %1239 = vmatpush1.bf16.msra.mxu1 %v1707_v47 }
 0x210   :  { %1240 = vmatprep.subr.bf16.mxu1 %v1715_v48 }
 0x213   :  { %1241 = vmatpush1.bf16.msra.mxu1 %v1713_v49 }
 0x214   :  { %1242 = vmatprep.subr.bf16.mxu1 %v1721_v50 }
 0x217   :  { %1243 = vmatpush1.bf16.msra.mxu1 %v1719_v51 }
 0x218   :  { %1244 = vmatprep.subr.bf16.mxu1 %v1727_v52 }
 0x21b   :  { %1245 = vmatpush1.bf16.msra.mxu1 %v1725_v53 }
 0x21c   :  { %1246 = vmatprep.subr.bf16.mxu1 %v1733_v54 }
 0x21f   :  { %1247 = vmatpush1.bf16.msra.mxu1 %v1731_v55 }
 0x220   :  { %1248 = vmatprep.subr.bf16.mxu1 %v1739_v56 }
 0x223   :  { %1249 = vmatpush1.bf16.msra.mxu1 %v1737_v57 }
 0x224   :  { %1250 = vmatprep.subr.bf16.mxu1 %v1745_v58 }
 0x227   :  { %1251 = vmatpush1.bf16.msra.mxu1 %v1743_v59 }
 0x228   :  { %1252 = vmatprep.subr.bf16.mxu1 %v1751_v60 }
 0x22b   :  { %1253 = vmatpush1.bf16.msra.mxu1 %v1749_v61 }
 0x22c   :  { %1254 = vmatprep.subr.bf16.mxu1 %v1757_v4 }
 0x22f   :  { %1255 = vmatpush1.bf16.msra.mxu1 %v1755_v62 }
 0x230   :  { %1256 = vmatprep.subr.bf16.mxu1 %v1763_v63 }
 0x233   :  { %1257 = vmatpush1.bf16.msra.mxu1 %v1761_v0 }
 0x234   :  { %1258 = vmatprep.subr.bf16.mxu1 %v1769_v1 }
 0x237   :  { %1259 = vmatpush1.bf16.msra.mxu1 %v1767_v7 }
 0x238   :  { %1260 = vmatprep.subr.bf16.mxu1 %v1775_v9 }
 0x23b   :  { %1261 = vmatpush1.bf16.msra.mxu1 %v1773_v11 }
 0x2d1   :  { %v813_v16 = vpop.f32.mrb[0].mxu1 }
 0x2d2   :  { %v814_v17 = vadd.f32 %v813_v16, %v612_v14  ;;  %v815_v18 = vpop.f32.mrb[1].mxu1 }
 0x2d3   :  { %v816_v19 = vadd.f32 %v815_v18, %v616_v15  ;;  %v817_v20 = vpop.f32.mrb[2].mxu1 }
 0x2d4   :  { %v820_v21 = vmax.f32 %v814_v17, 0.0  ;;  %v818_v22 = vpop.f32.mrb[3].mxu1 }
 0x2d5   :  { %v821_v23 = vmax.f32 %v816_v19, 0.0 }
 0x2d6   :  { %v822_v25 = vpack.c.bf16 %v820_v21, %v820_v21 }
 0x2d7   :  { %v823_v24 = vpack.c.bf16 %v821_v23, %v821_v23 }
 0x2d9   :  { %1262 = vmatprep.mubr.bf16.mxu1 %v823_v24  ;;  %1303 = vmatprep.mubr.bf16.mxu0 %v823_v24 }
 0x2da   :  { %1263 = vmatmul.mubr.bf16.vlgmr.msra.gmra.mrb[4].mxu1 %v822_v25  ;;  %1304 = vmatmul.mubr.bf16.vlgmr.msra.gmra.mrb[4].mxu0 %v822_v25 }
 0x3ad   :  { %v1264_v32 = vpop.f32.mrb[4].mxu1  ;;  %v1305_v33 = vpop.f32.mrb[4].mxu0 }
 0x3ae   :  { %v1265_v35 = vadd.f32 %v1264_v32, %v893_v29  ;;  %v1266_v36 = vpop.f32.mrb[5].mxu1  ;;  %v1307_v37 = vpop.f32.mrb[5].mxu0  ;;  %v1306_v38 = vadd.f32 %v1305_v33, %v901_v30 }
 0x3af   :  { %v1267_v39 = vadd.f32 %v1266_v36, %v897_v31  ;;  %v1268_v40 = vpop.f32.mrb[6].mxu1  ;;  %v1309_v41 = vpop.f32.mrb[6].mxu0  ;;  %v1308_v26 = vadd.f32 %v1307_v37, %v905_v34 }
 0x3b0   :  { %v1312_v42 = vmul.f32 %v1265_v35, %v1265_v35  ;;  %v1269_v43 = vpop.f32.mrb[7].mxu1  ;;  %v1310_v44 = vpop.f32.mrb[7].mxu0  ;;  %v1314_v46 = vmul.f32 %v1306_v38, %v1306_v38 }
 0x3b1   :  { %v1313_v45 = vmul.f32 %v1267_v39, %v1267_v39  ;;  %v1315_v47 = vmul.f32 %v1308_v26, %v1308_v26 }
 0x3b3   :  { %v1316_v3 = vadd.f32 %v1313_v45, %v1312_v42 }
 0x3b5   :  { %v1317_v48 = vadd.f32 %v1316_v3, %v1314_v46 }
 0x3b7   :  { %v1318_v2 = vadd.f32 %v1317_v48, %v1315_v47 }
 0x3b9   :  { %1319 = vadd.xlane.f32.xlu0 %v1318_v2 }
 0x446   :  { %v1320_v49 = vpop.xlane.xlu0 %1319 }
 0x447   :  { %v1321_v50 = vmax.f32 %v1320_v49, 1e-24 }
 0x449   :  { %1781 = vrsqrt.f32 %v1321_v50 }
 0x453   :  { %v1782_v51 = vpop.eup %1781 }
 0x454   :  { %v1323_v52 = vmul.f32 %v1782_v51, %v1265_v35  ;;  %v1324_v53 = vmul.f32 %v1782_v51, %v1267_v39  ;;  %v1325_v54 = vmul.f32 %v1782_v51, %v1306_v38  ;;  %v1326_v55 = vmul.f32 %v1782_v51, %v1308_v26 }
 0x456   :  { %v1523_v56 = vpack.c.bf16 %v1324_v53, %v1323_v52  ;;  %v1524_v57 = vpack.c.bf16 %v1326_v55, %v1325_v54 }
 0x458   :  { %1343 = vst [vmem:[#allocation8] sm:$0xff] %v1523_v56  ;;  %1344 = vst [vmem:[#allocation8 + $0x8] sm:$0xff] %v1524_v57 }
 0x459   :  { %1860 = shalt.err (!%p1857_p0)
}
 0x45a   :  { %s1861_s25 = scalar_lea.hbm %s2044_s7, 256 }
 0x45b   :  { %p1862_p1 = scmp.ne.s32.totalorder %s2044_s7, %s1861_s25  ;;  %p1865_p2 = scmp.lt.u32.totalorder %s1861_s25, %s2044_s7 }
 0x45d   :  { %p1867_p3 = pnand %p1865_p2, %p1862_p1 }
 0x45f   :  { %1870 = shalt.err (!%p1867_p3)
}
 0x460   :  { %1354 = dma.vmem_to_hbm [thread:$0]  %s1352_s22, 256, %s2044_s7, [#allocation4]  }
 0x461   :  { %1875 = dma.done.wait [#allocation4], 256  }
 0x462   :  { %1876 = vsyncadd [#allocation4], 4294967040 }
 0x463   :  { %1358 = vsyncpa [#allocation3], 1 }
 0x464   :  { %1359 = vsyncpa [#allocation6], 1 }
 0x465   :  { %1360 = vsyncpa [#allocation4], 1 }

</bundles_post_ra>
